<compile_context>
chip_gen: v7x
topology: tpu7x:2x2x1
jax: 0.10.0
libtpu: 0.0.40
codegen_flags: <defaults>
</compile_context>

<pallas_src>
import functools

import jax
import jax.numpy as jnp
from jax.experimental import pallas as pl
from jax.experimental.pallas import tpu as pltpu

F32 = jnp.float32
BF16 = jnp.bfloat16


def _layer_norm(v, g, b, eps):
    m = jnp.mean(v, axis=-1, keepdims=True)
    c = v - m
    var = jnp.mean(c * c, axis=-1, keepdims=True)
    return c * jax.lax.rsqrt(var + eps) * g + b


# ---------------------------------------------------------------------------
# Kernel A: LayerNorm1 + fused QKV projection (single (TS,D)x(D,3D) MXU matmul).
# ---------------------------------------------------------------------------
def _qkv_proj_kernel(x_ref, g1_ref, b1_ref, wqkv_ref, bqkv_ref,
                     q_ref, k_ref, v_ref, *, d_model, eps):
    x = x_ref[0].astype(F32)                                        # (TS, D)
    h = _layer_norm(x, g1_ref[0], b1_ref[0], eps).astype(BF16)      # cast once for the matmul
    qkv = jnp.dot(h, wqkv_ref[...], preferred_element_type=F32) + bqkv_ref[0]   # (TS, 3D) f32
    qkv = qkv.astype(BF16)                                          # cast once; consumed as bf16
    D = d_model
    q_ref[0] = qkv[:, :D]          # Q is pre-scaled by 1/sqrt(head_dim) (folded into weights)
    k_ref[0] = qkv[:, D:2 * D]
    v_ref[0] = qkv[:, 2 * D:]


# ---------------------------------------------------------------------------
# Kernel B: flash attention + output projection + residual + LN2 + FFN + residual.
# ---------------------------------------------------------------------------
def _attn_ffn_kernel(x_ref, q_ref, k_ref, v_ref,
                     wo_ref, bo_ref, g2_ref, b2_ref,
                     w1_ref, bb1_ref, w2_ref, bb2_ref,
                     o_ref,
                     m_sc, l_sc, acc_sc,
                     *, n_heads, head_dim, eps):
    ki = pl.program_id(2)
    nk = pl.num_programs(2)

    @pl.when(ki == 0)
    def _init():
        m_sc[...] = jnp.full_like(m_sc, -jnp.inf)
        l_sc[...] = jnp.zeros_like(l_sc)
        acc_sc[...] = jnp.zeros_like(acc_sc)

    q = q_ref[0]                                                    # (TQ, D) bf16 (pre-scaled)
    k = k_ref[0]                                                    # (TK, D) bf16
    v = v_ref[0]                                                    # (TK, D) bf16
    hd = head_dim

    # Online-softmax update per head (static Python loop; all matmuls are 2-D MXU calls).
    for h in range(n_heads):
        lo = h * hd
        qh = q[:, lo:lo + hd]                                       # (TQ, hd)
        kh = k[:, lo:lo + hd]                                       # (TK, hd)
        vh = v[:, lo:lo + hd]                                       # (TK, hd)
        s = jax.lax.dot_general(qh, kh, (((1,), (1,)), ((), ())),
                                preferred_element_type=F32)         # (TQ, TK) f32
        m_prev = m_sc[h]                                            # (TQ, 1)
        m_new = jnp.maximum(m_prev, jnp.max(s, axis=-1, keepdims=True))
        alpha = jnp.exp(m_prev - m_new)
        p = jnp.exp(s - m_new)                                      # (TQ, TK) f32
        l_sc[h] = alpha * l_sc[h] + jnp.sum(p, axis=-1, keepdims=True)
        acc_sc[h] = alpha * acc_sc[h] + jnp.dot(p.astype(BF16), vh,
                                                preferred_element_type=F32)
        m_sc[h] = m_new

    @pl.when(ki == nk - 1)
    def _finalize():
        # Heads become contiguous column blocks -> (TQ, D); head-sum of the output projection
        # folds into one lane-dense (TQ,D)x(D,D) matmul (no (H,S,D) intermediate).
        ctx = jnp.concatenate(
            [acc_sc[h] * pl.reciprocal(l_sc[h], approx=True) for h in range(n_heads)],
            axis=-1).astype(BF16)                                   # (TQ, D) bf16
        attn = jnp.dot(ctx, wo_ref[...], preferred_element_type=F32) + bo_ref[0]
        xq = x_ref[0].astype(F32)
        h1 = xq + attn                                              # residual (dropout = identity)
        h2 = _layer_norm(h1, g2_ref[0], b2_ref[0], eps).astype(BF16)
        f = jnp.dot(h2, w1_ref[...], preferred_element_type=F32) + bb1_ref[0]
        f = jax.nn.gelu(f, approximate=False).astype(BF16)          # PyTorch default erf-GELU
        f = jnp.dot(f, w2_ref[...], preferred_element_type=F32) + bb2_ref[0]
        o_ref[0] = (h1 + f).astype(o_ref.dtype)


# ---------------------------------------------------------------------------
# Host wrapper.
# ---------------------------------------------------------------------------
def _seq_tile(S, cap=256):
    for t in (cap, 256, 128, 64, 32, 16, 8):
        if t <= cap and S % t == 0:
            return t
    return S


def _vmem_limit(resident_bytes):
    try:
        cap = int(pltpu.get_tpu_info().vmem_capacity_bytes)         # generation-aware (v5e/v6e/v7x)
    except Exception:
        cap = 64 * 1024 * 1024
    want = max(int(resident_bytes * 1.3), 16 * 1024 * 1024)         # residency + scratch margin
    return int(min(want, int(cap * 0.85)))                          # keep compiler headroom


def transformer_block(x, params, *, n_heads, eps=1e-5, seq_tile=256):
    """params (raw PyTorch shapes):
    (ln1_g (1,D), ln1_b (1,D), in_proj_w (3D,D), in_proj_b (1,3D), out_w (D,D), out_b (1,D),
     ln2_g (1,D), ln2_b (1,D), ffn_w1 (4D,D), ffn_b1 (1,4D), ffn_w2 (D,4D), ffn_b2 (1,D))."""
    (g1, b1, wqkv, bqkv, wo, bo, g2, b2, w1, bb1, w2, bb2) = params
    B, S, D = x.shape
    assert D % n_heads == 0
    hd = D // n_heads
    d_ff = w1.shape[0]
    scale = 1.0 / float(hd) ** 0.5

    # ---- host-side weight restructuring (no in-kernel transposes) ----
    wq, wk, wv = wqkv[:D], wqkv[D:2 * D], wqkv[2 * D:]
    bq, bk, bv = bqkv[0, :D], bqkv[0, D:2 * D], bqkv[0, 2 * D:]
    wqkv_t = jnp.concatenate(
        [(wq.astype(F32) * scale).T, wk.astype(F32).T, wv.astype(F32).T],
        axis=1).astype(BF16)                                         # (D, 3D), Q-scale folded in
    bqkv_r = jnp.concatenate(
        [bq.astype(F32) * scale, bk.astype(F32), bv.astype(F32)]).reshape(1, 3 * D)

    wo_t = wo.astype(F32).T.astype(BF16)                             # (D, D)
    bo_r = bo.astype(F32).reshape(1, D)
    w1_t = w1.astype(F32).T.astype(BF16)                             # (D, 4D)
    w2_t = w2.astype(F32).T.astype(BF16)                             # (4D, D)
    bb1_r = bb1.astype(F32).reshape(1, d_ff)
    bb2_r = bb2.astype(F32).reshape(1, D)
    g1_r, b1_r = g1.astype(F32).reshape(1, D), b1.astype(F32).reshape(1, D)
    g2_r, b2_r = g2.astype(F32).reshape(1, D), b2.astype(F32).reshape(1, D)

    TS = _seq_tile(S, seq_tile)
    TQ = _seq_tile(S, seq_tile)
    TK = _seq_tile(S, seq_tile)
    nS, nQ, nK = S // TS, S // TQ, S // TK

    a_consts = (g1_r, b1_r, wqkv_t, bqkv_r)
    b_consts = (wo_t, bo_r, g2_r, b2_r, w1_t, bb1_r, w2_t, bb2_r)

    def _nbytes(a):
        return int(a.size) * a.dtype.itemsize

    const_idx2 = lambda b, s: (0, 0)          # all constant blocks are 2-D
    const_idx3 = lambda b, qi, ki: (0, 0)

    def _build(single_buffer_weights):
        def const_spec(arr, idx_map):
            if single_buffer_weights:
                # Constant block index across the whole grid -> no re-fetch; single-buffer it.
                return pl.BlockSpec(arr.shape, idx_map, pipeline_mode=pl.Buffered(1))
            return pl.BlockSpec(arr.shape, idx_map)

        wbuf = 1 if single_buffer_weights else 2

        # ---- kernel A: LN1 + fused QKV projection ----
        a_resident = (wbuf * sum(_nbytes(p) for p in a_consts)
                      + 2 * TS * D * x.dtype.itemsize                # x blocks (double-buffered)
                      + 2 * 3 * TS * D * 2                           # q/k/v out blocks (bf16)
                      + 6 * TS * 3 * D * 4)                          # matmul / LN intermediates
        qkv_call = pl.pallas_call(
            functools.partial(_qkv_proj_kernel, d_model=D, eps=eps),
            out_shape=[jax.ShapeDtypeStruct((B, S, D), BF16)] * 3,
            grid_spec=pltpu.PrefetchScalarGridSpec(
                num_scalar_prefetch=0,
                grid=(B, nS),
                in_specs=[pl.BlockSpec((1, TS, D), lambda b, s: (b, s, 0))]
                         + [const_spec(p, const_idx2) for p in a_consts],
                out_specs=[pl.BlockSpec((1, TS, D), lambda b, s: (b, s, 0))] * 3,
            ),
            compiler_params=pltpu.CompilerParams(
                dimension_semantics=("parallel", "parallel"),
                vmem_limit_bytes=_vmem_limit(a_resident)),
        )

        # ---- kernel B: flash attention + out-proj + LN2 + FFN ----
        b_resident = (wbuf * sum(_nbytes(p) for p in b_consts)
                      + 2 * TQ * D * (x.dtype.itemsize + 2)          # x + q blocks
                      + 2 * 2 * TK * D * 2                           # k, v blocks
                      + 2 * TQ * D * x.dtype.itemsize                # output block
                      + n_heads * TQ * (2 * 128 + max(hd, 128)) * 4  # m/l/acc scratch (lane-padded)
                      + 3 * TQ * TK * 4                              # live per-head score tiles
                      + 3 * TQ * d_ff * 4)                           # FFN intermediates
        attn_call = pl.pallas_call(
            functools.partial(_attn_ffn_kernel, n_heads=n_heads, head_dim=hd, eps=eps),
            out_shape=jax.ShapeDtypeStruct((B, S, D), x.dtype),
            grid_spec=pltpu.PrefetchScalarGridSpec(
                num_scalar_prefetch=0,
                grid=(B, nQ, nK),
                in_specs=[pl.BlockSpec((1, TQ, D), lambda b, qi, ki: (b, qi, 0)),   # x (residual)
                          pl.BlockSpec((1, TQ, D), lambda b, qi, ki: (b, qi, 0)),   # q
                          pl.BlockSpec((1, TK, D), lambda b, qi, ki: (b, ki, 0)),   # k
                          pl.BlockSpec((1, TK, D), lambda b, qi, ki: (b, ki, 0))]   # v
                         + [const_spec(p, const_idx3) for p in b_consts],
                out_specs=pl.BlockSpec((1, TQ, D), lambda b, qi, ki: (b, qi, 0)),
                scratch_shapes=[pltpu.VMEM((n_heads, TQ, 1), F32),    # running max
                                pltpu.VMEM((n_heads, TQ, 1), F32),    # running sum
                                pltpu.VMEM((n_heads, TQ, hd), F32)],  # context accumulator
            ),
            compiler_params=pltpu.CompilerParams(
                dimension_semantics=("parallel", "parallel", "arbitrary"),
                vmem_limit_bytes=_vmem_limit(b_resident)),
        )

        def fwd(x_in):
            q, k, v = qkv_call(x_in, *a_consts)
            return attn_call(x_in, q, k, v, *b_consts)

        return fwd

    try:
        out = _build(True)(x)
        return jax.block_until_ready(out)
    except Exception:
        # pipeline_mode=pl.Buffered(1) not supported on this jax version -> default buffering.
        out = _build(False)(x)
        return jax.block_until_ready(out)


# ---------------------------------------------------------------------------
# Pure-JAX reference (mirrors the PyTorch forward with attention_mask=None, eval mode).
# ---------------------------------------------------------------------------
def reference(x, params, *, n_heads, eps=1e-5):
    (g1, b1, wqkv, bqkv, wo, bo, g2, b2, w1, bb1, w2, bb2) = params
    B, S, D = x.shape
    hd = D // n_heads

    def ln(v, g, b):
        m = v.mean(-1, keepdims=True)
        var = ((v - m) ** 2).mean(-1, keepdims=True)
        return (v - m) / jnp.sqrt(var + eps) * g + b

    h = ln(x, g1[0], b1[0])
    qkv = h @ wqkv.T + bqkv[0]
    q, k, v = qkv[..., :D], qkv[..., D:2 * D], qkv[..., 2 * D:]
    q = q.reshape(B, S, n_heads, hd).transpose(0, 2, 1, 3)
    k = k.reshape(B, S, n_heads, hd).transpose(0, 2, 1, 3)
    v = v.reshape(B, S, n_heads, hd).transpose(0, 2, 1, 3)
    s = (q @ jnp.swapaxes(k, -1, -2)) / jnp.sqrt(jnp.float32(hd))
    p = jax.nn.softmax(s, -1)
    a = (p @ v).transpose(0, 2, 1, 3).reshape(B, S, D)
    a = a @ wo.T + bo[0]
    h1 = x + a
    h2 = ln(h1, g2[0], b2[0])
    f = jax.nn.gelu(h2 @ w1.T + bb1[0], approximate=False)
    f = f @ w2.T + bb2[0]
    return h1 + f


if __name__ == "__main__":
    # small demo shapes, d_model divisible by n_heads
    B, S, D, n_heads = 2, 8, 32, 4
    d_ff = 4 * D

    key = jax.random.PRNGKey(0)
    keys = jax.random.split(key, 16)

    def nrm(k, shape, scale=0.05):
        return (scale * jax.random.normal(k, shape)).astype(jnp.float32)

    x = nrm(keys[0], (B, S, D), scale=1.0)

    params = (
        jnp.ones((1, D), jnp.float32),            # ln1 gamma
        jnp.zeros((1, D), jnp.float32),           # ln1 beta
        nrm(keys[1], (3 * D, D)),                 # in_proj_weight
        nrm(keys[2], (1, 3 * D)),                 # in_proj_bias
        nrm(keys[3], (D, D)),                     # out_proj.weight
        nrm(keys[4], (1, D)),                     # out_proj.bias
        jnp.ones((1, D), jnp.float32),            # ln2 gamma
        jnp.zeros((1, D), jnp.float32),           # ln2 beta
        nrm(keys[5], (d_ff, D)),                  # ffn linear1 weight
        nrm(keys[6], (1, d_ff)),                  # ffn linear1 bias
        nrm(keys[7], (D, d_ff)),                  # ffn linear2 weight
        nrm(keys[8], (1, D)),                     # ffn linear2 bias
    )

    out = transformer_block(x, params, n_heads=n_heads, eps=1e-5)
    out = jax.block_until_ready(out)

    ref = reference(x, params, n_heads=n_heads, eps=1e-5)
    assert out.shape == (B, S, D)
    # bf16 matmul operands + approx softmax reciprocal vs full-f32 reference.
    assert jnp.allclose(out, ref, atol=2e-2, rtol=2e-2), "Pallas output mismatch vs reference"
    print("KERNEL_OK")
</pallas_src>

<mosaic_0001>
module attributes {stable_mosaic.version = 11 : i64} {
  func.func @_qkv_proj_kernel(%arg0: i32, %arg1: i32, %arg2: memref<1x8x32xf32, #tpu.memory_space<vmem>>, %arg3: memref<1x32xf32, #tpu.memory_space<vmem>>, %arg4: memref<1x32xf32, #tpu.memory_space<vmem>>, %arg5: memref<32x96xbf16, #tpu.memory_space<vmem>>, %arg6: memref<1x96xf32, #tpu.memory_space<vmem>>, %arg7: memref<1x8x32xbf16, #tpu.memory_space<vmem>>, %arg8: memref<1x8x32xbf16, #tpu.memory_space<vmem>>, %arg9: memref<1x8x32xbf16, #tpu.memory_space<vmem>>) attributes {dimension_semantics = [#tpu.dimension_semantics<parallel>, #tpu.dimension_semantics<parallel>], iteration_bounds = array<i64: 2, 1>, scalar_prefetch = 0 : i64, scratch_operands = 0 : i64, tpu.core_type = #tpu.core_type<tc>, window_params = [{transform_indices = @transform_0, window_bounds = array<i64: 1, 8, 32>}, {pipeline_mode = #tpu.pipeline_mode<synchronous>, transform_indices = @transform_1, window_bounds = array<i64: 1, 32>}, {pipeline_mode = #tpu.pipeline_mode<synchronous>, transform_indices = @transform_2, window_bounds = array<i64: 1, 32>}, {pipeline_mode = #tpu.pipeline_mode<synchronous>, transform_indices = @transform_3, window_bounds = array<i64: 32, 96>}, {pipeline_mode = #tpu.pipeline_mode<synchronous>, transform_indices = @transform_4, window_bounds = array<i64: 1, 96>}, {transform_indices = @transform_5, window_bounds = array<i64: 1, 8, 32>}, {transform_indices = @transform_6, window_bounds = array<i64: 1, 8, 32>}, {transform_indices = @transform_7, window_bounds = array<i64: 1, 8, 32>}]} {
    %c0 = arith.constant 0 : index
    %c0_0 = arith.constant 0 : index
    %c0_1 = arith.constant 0 : index
    %0 = vector.load %arg2[%c0, %c0_0, %c0_1] : memref<1x8x32xf32, #tpu.memory_space<vmem>>, vector<1x8x32xf32>
    %1 = vector.shape_cast %0 : vector<1x8x32xf32> to vector<8x32xf32>
    %c0_2 = arith.constant 0 : index
    %c0_3 = arith.constant 0 : index
    %2 = vector.load %arg3[%c0_2, %c0_3] : memref<1x32xf32, #tpu.memory_space<vmem>>, vector<1x32xf32>
    %3 = vector.shape_cast %2 : vector<1x32xf32> to vector<32xf32>
    %c0_4 = arith.constant 0 : index
    %c0_5 = arith.constant 0 : index
    %4 = vector.load %arg4[%c0_4, %c0_5] : memref<1x32xf32, #tpu.memory_space<vmem>>, vector<1x32xf32>
    %5 = vector.shape_cast %4 : vector<1x32xf32> to vector<32xf32>
    %cst = arith.constant dense<0.000000e+00> : vector<8xf32>
    %6 = vector.multi_reduction <add>, %1, %cst [1] : vector<8x32xf32> to vector<8xf32>
    %7 = vector.shape_cast %6 : vector<8xf32> to vector<8x1xf32>
    %cst_6 = arith.constant 3.200000e+01 : f32
    %8 = vector.broadcast %cst_6 : f32 to vector<8x1xf32>
    %9 = arith.divf %7, %8 : vector<8x1xf32>
    %10 = vector.broadcast %9 : vector<8x1xf32> to vector<8x32xf32>
    %11 = arith.subf %1, %10 : vector<8x32xf32>
    %12 = arith.mulf %11, %11 : vector<8x32xf32>
    %cst_7 = arith.constant dense<0.000000e+00> : vector<8xf32>
    %13 = vector.multi_reduction <add>, %12, %cst_7 [1] : vector<8x32xf32> to vector<8xf32>
    %14 = vector.shape_cast %13 : vector<8xf32> to vector<8x1xf32>
    %cst_8 = arith.constant 3.200000e+01 : f32
    %15 = vector.broadcast %cst_8 : f32 to vector<8x1xf32>
    %16 = arith.divf %14, %15 : vector<8x1xf32>
    %cst_9 = arith.constant 9.99999974E-6 : f32
    %17 = vector.broadcast %cst_9 : f32 to vector<8x1xf32>
    %18 = arith.addf %16, %17 : vector<8x1xf32>
    %19 = math.rsqrt %18 : vector<8x1xf32>
    %20 = vector.broadcast %19 : vector<8x1xf32> to vector<8x32xf32>
    %21 = arith.mulf %11, %20 : vector<8x32xf32>
    %22 = vector.shape_cast %3 : vector<32xf32> to vector<1x32xf32>
    %23 = vector.broadcast %22 : vector<1x32xf32> to vector<8x32xf32>
    %24 = arith.mulf %21, %23 : vector<8x32xf32>
    %25 = vector.shape_cast %5 : vector<32xf32> to vector<1x32xf32>
    %26 = vector.broadcast %25 : vector<1x32xf32> to vector<8x32xf32>
    %27 = arith.addf %24, %26 : vector<8x32xf32>
    %28 = arith.truncf %27 : vector<8x32xf32> to vector<8x32xbf16>
    %c0_10 = arith.constant 0 : index
    %c0_11 = arith.constant 0 : index
    %29 = vector.load %arg5[%c0_10, %c0_11] : memref<32x96xbf16, #tpu.memory_space<vmem>>, vector<32x96xbf16>
    %cst_12 = arith.constant dense<0.000000e+00> : vector<8x96xf32>
    %30 = tpu.matmul %28, %29, %cst_12 {dimension_numbers = #tpu.dot_dimension_numbers<[1], [0], [0], [1], [0, 0, 1, 1], [], []>} : vector<8x32xbf16>, vector<32x96xbf16>, vector<8x96xf32> -> vector<8x96xf32>
    %c0_13 = arith.constant 0 : index
    %c0_14 = arith.constant 0 : index
    %31 = vector.load %arg6[%c0_13, %c0_14] : memref<1x96xf32, #tpu.memory_space<vmem>>, vector<1x96xf32>
    %32 = vector.shape_cast %31 : vector<1x96xf32> to vector<96xf32>
    %33 = vector.shape_cast %32 : vector<96xf32> to vector<1x96xf32>
    %34 = vector.broadcast %33 : vector<1x96xf32> to vector<8x96xf32>
    %35 = arith.addf %30, %34 : vector<8x96xf32>
    %36 = arith.truncf %35 : vector<8x96xf32> to vector<8x96xbf16>
    %37 = vector.extract_strided_slice %36 {offsets = [0, 0], sizes = [8, 32], strides = [1, 1]} : vector<8x96xbf16> to vector<8x32xbf16>
    %c0_15 = arith.constant 0 : index
    %c0_16 = arith.constant 0 : index
    %c0_17 = arith.constant 0 : index
    %38 = vector.load %arg7[%c0_15, %c0_16, %c0_17] : memref<1x8x32xbf16, #tpu.memory_space<vmem>>, vector<1x8x32xbf16>
    %39 = vector.shape_cast %38 : vector<1x8x32xbf16> to vector<8x32xbf16>
    %40 = vector.shape_cast %37 : vector<8x32xbf16> to vector<1x8x32xbf16>
    tpu.vector_store %arg7[%c0_15, %c0_16, %c0_17], %40 {strides = array<i32>} : memref<1x8x32xbf16, #tpu.memory_space<vmem>>, vector<1x8x32xbf16>,
    %41 = vector.extract_strided_slice %36 {offsets = [0, 32], sizes = [8, 32], strides = [1, 1]} : vector<8x96xbf16> to vector<8x32xbf16>
    %c0_18 = arith.constant 0 : index
    %c0_19 = arith.constant 0 : index
    %c0_20 = arith.constant 0 : index
    %42 = vector.load %arg8[%c0_18, %c0_19, %c0_20] : memref<1x8x32xbf16, #tpu.memory_space<vmem>>, vector<1x8x32xbf16>
    %43 = vector.shape_cast %42 : vector<1x8x32xbf16> to vector<8x32xbf16>
    %44 = vector.shape_cast %41 : vector<8x32xbf16> to vector<1x8x32xbf16>
    tpu.vector_store %arg8[%c0_18, %c0_19, %c0_20], %44 {strides = array<i32>} : memref<1x8x32xbf16, #tpu.memory_space<vmem>>, vector<1x8x32xbf16>,
    %45 = vector.extract_strided_slice %36 {offsets = [0, 64], sizes = [8, 32], strides = [1, 1]} : vector<8x96xbf16> to vector<8x32xbf16>
    %c0_21 = arith.constant 0 : index
    %c0_22 = arith.constant 0 : index
    %c0_23 = arith.constant 0 : index
    %46 = vector.load %arg9[%c0_21, %c0_22, %c0_23] : memref<1x8x32xbf16, #tpu.memory_space<vmem>>, vector<1x8x32xbf16>
    %47 = vector.shape_cast %46 : vector<1x8x32xbf16> to vector<8x32xbf16>
    %48 = vector.shape_cast %45 : vector<8x32xbf16> to vector<1x8x32xbf16>
    tpu.vector_store %arg9[%c0_21, %c0_22, %c0_23], %48 {strides = array<i32>} : memref<1x8x32xbf16, #tpu.memory_space<vmem>>, vector<1x8x32xbf16>,
    return
  }
  func.func @transform_0(%arg0: i32, %arg1: i32) -> (i32, i32, i32) {
    %c0_i32 = arith.constant 0 : i32
    %c0_i32_0 = arith.constant 0 : i32
    return %arg0, %arg1, %c0_i32 : i32, i32, i32
  }
  func.func @transform_1(%arg0: i32, %arg1: i32) -> (i32, i32) {
    %c0_i32 = arith.constant 0 : i32
    %c0_i32_0 = arith.constant 0 : i32
    %c0_i32_1 = arith.constant 0 : i32
    return %c0_i32, %c0_i32_0 : i32, i32
  }
  func.func @transform_2(%arg0: i32, %arg1: i32) -> (i32, i32) {
    %c0_i32 = arith.constant 0 : i32
    %c0_i32_0 = arith.constant 0 : i32
    %c0_i32_1 = arith.constant 0 : i32
    return %c0_i32, %c0_i32_0 : i32, i32
  }
  func.func @transform_3(%arg0: i32, %arg1: i32) -> (i32, i32) {
    %c0_i32 = arith.constant 0 : i32
    %c0_i32_0 = arith.constant 0 : i32
    %c0_i32_1 = arith.constant 0 : i32
    return %c0_i32, %c0_i32_0 : i32, i32
  }
  func.func @transform_4(%arg0: i32, %arg1: i32) -> (i32, i32) {
    %c0_i32 = arith.constant 0 : i32
    %c0_i32_0 = arith.constant 0 : i32
    %c0_i32_1 = arith.constant 0 : i32
    return %c0_i32, %c0_i32_0 : i32, i32
  }
  func.func @transform_5(%arg0: i32, %arg1: i32) -> (i32, i32, i32) {
    %c0_i32 = arith.constant 0 : i32
    %c0_i32_0 = arith.constant 0 : i32
    return %arg0, %arg1, %c0_i32 : i32, i32, i32
  }
  func.func @transform_6(%arg0: i32, %arg1: i32) -> (i32, i32, i32) {
    %c0_i32 = arith.constant 0 : i32
    %c0_i32_0 = arith.constant 0 : i32
    return %arg0, %arg1, %c0_i32 : i32, i32, i32
  }
  func.func @transform_7(%arg0: i32, %arg1: i32) -> (i32, i32, i32) {
    %c0_i32 = arith.constant 0 : i32
    %c0_i32_0 = arith.constant 0 : i32
    return %arg0, %arg1, %c0_i32 : i32, i32, i32
  }
}

module attributes {stable_mosaic.version = 11 : i64} {
  func.func @_qkv_proj_kernel(%arg0: i32, %arg1: i32, %arg2: memref<1x8x32xf32, #tpu.memory_space<vmem>>, %arg3: memref<1x32xf32, #tpu.memory_space<vmem>>, %arg4: memref<1x32xf32, #tpu.memory_space<vmem>>, %arg5: memref<32x96xbf16, #tpu.memory_space<vmem>>, %arg6: memref<1x96xf32, #tpu.memory_space<vmem>>, %arg7: memref<1x8x32xbf16, #tpu.memory_space<vmem>>, %arg8: memref<1x8x32xbf16, #tpu.memory_space<vmem>>, %arg9: memref<1x8x32xbf16, #tpu.memory_space<vmem>>) attributes {dimension_semantics = [#tpu.dimension_semantics<parallel>, #tpu.dimension_semantics<parallel>], iteration_bounds = array<i64: 2, 1>, scalar_prefetch = 0 : i64, scratch_operands = 0 : i64, tpu.core_type = #tpu.core_type<tc>, window_params = [{transform_indices = @transform_0, window_bounds = array<i64: 1, 8, 32>}, {pipeline_mode = #tpu.pipeline_mode<synchronous>, transform_indices = @transform_1, window_bounds = array<i64: 1, 32>}, {pipeline_mode = #tpu.pipeline_mode<synchronous>, transform_indices = @transform_2, window_bounds = array<i64: 1, 32>}, {pipeline_mode = #tpu.pipeline_mode<synchronous>, transform_indices = @transform_3, window_bounds = array<i64: 32, 96>}, {pipeline_mode = #tpu.pipeline_mode<synchronous>, transform_indices = @transform_4, window_bounds = array<i64: 1, 96>}, {transform_indices = @transform_5, window_bounds = array<i64: 1, 8, 32>}, {transform_indices = @transform_6, window_bounds = array<i64: 1, 8, 32>}, {transform_indices = @transform_7, window_bounds = array<i64: 1, 8, 32>}]} {
    %c0 = arith.constant 0 : index
    %c0_0 = arith.constant 0 : index
    %c0_1 = arith.constant 0 : index
    %0 = vector.load %arg2[%c0, %c0_0, %c0_1] : memref<1x8x32xf32, #tpu.memory_space<vmem>>, vector<1x8x32xf32>
    %1 = vector.shape_cast %0 : vector<1x8x32xf32> to vector<8x32xf32>
    %c0_2 = arith.constant 0 : index
    %c0_3 = arith.constant 0 : index
    %2 = vector.load %arg3[%c0_2, %c0_3] : memref<1x32xf32, #tpu.memory_space<vmem>>, vector<1x32xf32>
    %3 = vector.shape_cast %2 : vector<1x32xf32> to vector<32xf32>
    %c0_4 = arith.constant 0 : index
    %c0_5 = arith.constant 0 : index
    %4 = vector.load %arg4[%c0_4, %c0_5] : memref<1x32xf32, #tpu.memory_space<vmem>>, vector<1x32xf32>
    %5 = vector.shape_cast %4 : vector<1x32xf32> to vector<32xf32>
    %cst = arith.constant dense<0.000000e+00> : vector<8xf32>
    %6 = vector.multi_reduction <add>, %1, %cst [1] : vector<8x32xf32> to vector<8xf32>
    %7 = vector.shape_cast %6 : vector<8xf32> to vector<8x1xf32>
    %cst_6 = arith.constant 3.200000e+01 : f32
    %8 = vector.broadcast %cst_6 : f32 to vector<8x1xf32>
    %9 = arith.divf %7, %8 : vector<8x1xf32>
    %10 = vector.broadcast %9 : vector<8x1xf32> to vector<8x32xf32>
    %11 = arith.subf %1, %10 : vector<8x32xf32>
    %12 = arith.mulf %11, %11 : vector<8x32xf32>
    %cst_7 = arith.constant dense<0.000000e+00> : vector<8xf32>
    %13 = vector.multi_reduction <add>, %12, %cst_7 [1] : vector<8x32xf32> to vector<8xf32>
    %14 = vector.shape_cast %13 : vector<8xf32> to vector<8x1xf32>
    %cst_8 = arith.constant 3.200000e+01 : f32
    %15 = vector.broadcast %cst_8 : f32 to vector<8x1xf32>
    %16 = arith.divf %14, %15 : vector<8x1xf32>
    %cst_9 = arith.constant 9.99999974E-6 : f32
    %17 = vector.broadcast %cst_9 : f32 to vector<8x1xf32>
    %18 = arith.addf %16, %17 : vector<8x1xf32>
    %19 = math.rsqrt %18 : vector<8x1xf32>
    %20 = vector.broadcast %19 : vector<8x1xf32> to vector<8x32xf32>
    %21 = arith.mulf %11, %20 : vector<8x32xf32>
    %22 = vector.shape_cast %3 : vector<32xf32> to vector<1x32xf32>
    %23 = vector.broadcast %22 : vector<1x32xf32> to vector<8x32xf32>
    %24 = arith.mulf %21, %23 : vector<8x32xf32>
    %25 = vector.shape_cast %5 : vector<32xf32> to vector<1x32xf32>
    %26 = vector.broadcast %25 : vector<1x32xf32> to vector<8x32xf32>
    %27 = arith.addf %24, %26 : vector<8x32xf32>
    %28 = arith.truncf %27 : vector<8x32xf32> to vector<8x32xbf16>
    %c0_10 = arith.constant 0 : index
    %c0_11 = arith.constant 0 : index
    %29 = vector.load %arg5[%c0_10, %c0_11] : memref<32x96xbf16, #tpu.memory_space<vmem>>, vector<32x96xbf16>
    %cst_12 = arith.constant dense<0.000000e+00> : vector<8x96xf32>
    %30 = tpu.matmul %28, %29, %cst_12 {dimension_numbers = #tpu.dot_dimension_numbers<[1], [0], [0], [1], [0, 0, 1, 1], [], []>} : vector<8x32xbf16>, vector<32x96xbf16>, vector<8x96xf32> -> vector<8x96xf32>
    %c0_13 = arith.constant 0 : index
    %c0_14 = arith.constant 0 : index
    %31 = vector.load %arg6[%c0_13, %c0_14] : memref<1x96xf32, #tpu.memory_space<vmem>>, vector<1x96xf32>
    %32 = vector.shape_cast %31 : vector<1x96xf32> to vector<96xf32>
    %33 = vector.shape_cast %32 : vector<96xf32> to vector<1x96xf32>
    %34 = vector.broadcast %33 : vector<1x96xf32> to vector<8x96xf32>
    %35 = arith.addf %30, %34 : vector<8x96xf32>
    %36 = arith.truncf %35 : vector<8x96xf32> to vector<8x96xbf16>
    %37 = vector.extract_strided_slice %36 {offsets = [0, 0], sizes = [8, 32], strides = [1, 1]} : vector<8x96xbf16> to vector<8x32xbf16>
    %c0_15 = arith.constant 0 : index
    %c0_16 = arith.constant 0 : index
    %c0_17 = arith.constant 0 : index
    %38 = vector.load %arg7[%c0_15, %c0_16, %c0_17] : memref<1x8x32xbf16, #tpu.memory_space<vmem>>, vector<1x8x32xbf16>
    %39 = vector.shape_cast %38 : vector<1x8x32xbf16> to vector<8x32xbf16>
    %40 = vector.shape_cast %37 : vector<8x32xbf16> to vector<1x8x32xbf16>
    tpu.vector_store %arg7[%c0_15, %c0_16, %c0_17], %40 {strides = array<i32>} : memref<1x8x32xbf16, #tpu.memory_space<vmem>>, vector<1x8x32xbf16>,
    %41 = vector.extract_strided_slice %36 {offsets = [0, 32], sizes = [8, 32], strides = [1, 1]} : vector<8x96xbf16> to vector<8x32xbf16>
    %c0_18 = arith.constant 0 : index
    %c0_19 = arith.constant 0 : index
    %c0_20 = arith.constant 0 : index
    %42 = vector.load %arg8[%c0_18, %c0_19, %c0_20] : memref<1x8x32xbf16, #tpu.memory_space<vmem>>, vector<1x8x32xbf16>
    %43 = vector.shape_cast %42 : vector<1x8x32xbf16> to vector<8x32xbf16>
    %44 = vector.shape_cast %41 : vector<8x32xbf16> to vector<1x8x32xbf16>
    tpu.vector_store %arg8[%c0_18, %c0_19, %c0_20], %44 {strides = array<i32>} : memref<1x8x32xbf16, #tpu.memory_space<vmem>>, vector<1x8x32xbf16>,
    %45 = vector.extract_strided_slice %36 {offsets = [0, 64], sizes = [8, 32], strides = [1, 1]} : vector<8x96xbf16> to vector<8x32xbf16>
    %c0_21 = arith.constant 0 : index
    %c0_22 = arith.constant 0 : index
    %c0_23 = arith.constant 0 : index
    %46 = vector.load %arg9[%c0_21, %c0_22, %c0_23] : memref<1x8x32xbf16, #tpu.memory_space<vmem>>, vector<1x8x32xbf16>
    %47 = vector.shape_cast %46 : vector<1x8x32xbf16> to vector<8x32xbf16>
    %48 = vector.shape_cast %45 : vector<8x32xbf16> to vector<1x8x32xbf16>
    tpu.vector_store %arg9[%c0_21, %c0_22, %c0_23], %48 {strides = array<i32>} : memref<1x8x32xbf16, #tpu.memory_space<vmem>>, vector<1x8x32xbf16>,
    return
  }
  func.func @transform_0(%arg0: i32, %arg1: i32) -> (i32, i32, i32) {
    %c0_i32 = arith.constant 0 : i32
    %c0_i32_0 = arith.constant 0 : i32
    return %arg0, %arg1, %c0_i32 : i32, i32, i32
  }
  func.func @transform_1(%arg0: i32, %arg1: i32) -> (i32, i32) {
    %c0_i32 = arith.constant 0 : i32
    %c0_i32_0 = arith.constant 0 : i32
    %c0_i32_1 = arith.constant 0 : i32
    return %c0_i32, %c0_i32_0 : i32, i32
  }
  func.func @transform_2(%arg0: i32, %arg1: i32) -> (i32, i32) {
    %c0_i32 = arith.constant 0 : i32
    %c0_i32_0 = arith.constant 0 : i32
    %c0_i32_1 = arith.constant 0 : i32
    return %c0_i32, %c0_i32_0 : i32, i32
  }
  func.func @transform_3(%arg0: i32, %arg1: i32) -> (i32, i32) {
    %c0_i32 = arith.constant 0 : i32
    %c0_i32_0 = arith.constant 0 : i32
    %c0_i32_1 = arith.constant 0 : i32
    return %c0_i32, %c0_i32_0 : i32, i32
  }
  func.func @transform_4(%arg0: i32, %arg1: i32) -> (i32, i32) {
    %c0_i32 = arith.constant 0 : i32
    %c0_i32_0 = arith.constant 0 : i32
    %c0_i32_1 = arith.constant 0 : i32
    return %c0_i32, %c0_i32_0 : i32, i32
  }
  func.func @transform_5(%arg0: i32, %arg1: i32) -> (i32, i32, i32) {
    %c0_i32 = arith.constant 0 : i32
    %c0_i32_0 = arith.constant 0 : i32
    return %arg0, %arg1, %c0_i32 : i32, i32, i32
  }
  func.func @transform_6(%arg0: i32, %arg1: i32) -> (i32, i32, i32) {
    %c0_i32 = arith.constant 0 : i32
    %c0_i32_0 = arith.constant 0 : i32
    return %arg0, %arg1, %c0_i32 : i32, i32, i32
  }
  func.func @transform_7(%arg0: i32, %arg1: i32) -> (i32, i32, i32) {
    %c0_i32 = arith.constant 0 : i32
    %c0_i32_0 = arith.constant 0 : i32
    return %arg0, %arg1, %c0_i32 : i32, i32, i32
  }
}

</mosaic_0001>

<bundles_post_ra>
// kernel: tpu_custom_call.1
= control target key start
LH: loop header
LB: loop body
LE: loop exit
PB: predicated region body
PF: predicated region fallthrough
CT: control target
= control target key end

     0   :  { %s1366_s0 = inlined_call_operand.hbm [shape: f32[2,8,32], index: 0, kind: input, shape index: {}]   ;;  %s1367_s1 = inlined_call_operand.vmem [shape: f32[1,32], index: 1, kind: input, shape index: {}]   ;;  %s1368_s2 = inlined_call_operand.vmem [shape: f32[1,32], index: 2, kind: input, shape index: {}]   ;;  %s1369_s3 = inlined_call_operand.hbm [shape: bf16[32,96], index: 3, kind: input, shape index: {}]   ;;  %s1370_s4 = inlined_call_operand.vmem [shape: f32[1,96], index: 4, kind: input, shape index: {}]   ;;  %s1371_s5 = inlined_call_operand.hbm [shape: bf16[2,8,32], index: 5, kind: output, shape index: {0}]   ;;  %s1372_s6 = inlined_call_operand.hbm [shape: bf16[2,8,32], index: 6, kind: output, shape index: {1}]   ;;  %s1373_s7 = inlined_call_operand.hbm [shape: bf16[2,8,32], index: 7, kind: output, shape index: {2}]  }
   0x1   :  { %1379 = sst [smem:[#allocation16_spill]] %s1369_s3 }
   0x2   :  { %13 = vsyncpa [#allocation3], 0 }
   0x3   :  { %15 = vsyncpa [#allocation3 + $0x1], 0 }
   0x4   :  { %16 = vsyncpa [#allocation6], 0 }
   0x5   :  { %17 = vsyncpa [#allocation4], 0 }
   0x6   :  { %19 = vsyncpa [#allocation4 + $0x1], 0 }
   0x7   :  { %20 = vsyncpa [#allocation9], 0 }
   0x8   :  { %22 = vsyncpa [#allocation9 + $0x1], 0  ;;  %s1058_s24 = smov 0   ;;  %s1060_s25 = smov 0  }
   0x9   :  { %s1062_s26 = smov 0   ;;  %s1064_s27 = smov 0  }
   0xa   :  { %s1066_s28 = smov 0   ;;  %s1068_s29 = smov 0  }
   0xb LB: > { %s1089_s30 = sadd.s32 4294967295, %s1005_s29   ;;  %s1377_s8 = sadd.s32 4294967294, %s1005_s29   ;;  %s1005_s29 = sphi %s1068_s29, %s28_s29   ;;  %s1001_s28 = sphi %s1066_s28, %s1402_s28   ;;  %s997_s27 = sphi %s1064_s27, %s1401_s27   ;;  %s993_s26 = sphi %s1062_s26, %s1400_s26   ;;  %s989_s25 = sphi %s1060_s25, %s1399_s25   ;;  %s985_s24 = sphi %s1058_s24, %s1398_s24  }
   0xc   : > { %p62_p0 = scmp.ne.s32.totalorder %s989_s25, %s985_s24  ;;  %p1374_p1 = scmp.eq.s32.totalorder %s1089_s30, 0 }
   0xd   : > { %p178_p3 = scmp.eq.s32.totalorder %s1377_s8, 1  ;;  %p670_p5 = scmp.ge.s32.totalorder %s1005_s29, 1 }
   0xe   : > { %p1100_p4 = por %p1374_p1, %p62_p0  ;;  %p241_p7 = scmp.lt.s32.totalorder %s1005_s29, 3 }
   0xf   : > { %p1105_p6 = por %p178_p3, %p62_p0  ;;  %s1007_s12 = smov [#allocation5]  }
  0x10   : > { %s1380_s9 = scalar_select %p1100_p4, 1, 0 }
  0x11   : > { %s1381_s10 = scalar_select %p1105_p6, 1, 0 }
  0x12   : > { %p1110_p8 = pnand %p670_p5, %p241_p7  ;;  %s259_s13 = sshll.u32 %s1007_s12, 4  ;;  %s260_s13 = int_to_ptr.vmem [resolvable:$true] %s259_s13 }
  0x13   : > { %s40_s15 = sadd.s32 1, %s1001_s28  ;;  %s1384_s3 = sld [smem:[#allocation16_spill]] }
  0x14   : > { %s1382_s11 = scalar_select %p1110_p8, 1, 0 }
  0x15   : > { %p720_p9 = pneg %p1110_p8 }
  0x17   : > { %p1119_p11 = pnand %p720_p9, %p1374_p1 }
  0x19   : > { %s801_s18 = scalar_lea.hbm %s1384_s3, 256  ;;  %p803_p13 = pneg %p1119_p11 }
  0x1a   : > { %p802_p12 = scmp.ne.s32.totalorder %s1384_s3, %s801_s18  ;;  %p808_p5 = scmp.lt.u32.totalorder %s801_s18, %s1384_s3 }
  0x1c   : > { %p804_p0 = pnand %p803_p13, %p802_p12 }
  0x1e   : > { %p805_p3 = pneg %p804_p0 }
  0x20   : > { %p810_p7 = pnand %p808_p5, %p805_p3 }
  0x22   : > { %813 = shalt.err (!%p810_p7)
}
  0x23   : > { %s814_s23 = scalar_lea.vmem %s260_s13, 256  ;;  %p822_p2 = scmp.lt.s32.totalorder %s260_s13, %s260_s13 }
  0x24   : > { %p815_p9 = scmp.ne.s32.totalorder %s260_s13, %s814_s23  ;;  %p823_p6 = scmp.lt.s32.totalorder %s814_s23, %s814_s23 }
  0x26   : > { %p817_p10 = pnand %p815_p9, %p803_p13  ;;  %p824_p4 = por %p823_p6, %p822_p2 }
  0x28   : > { %p818_p1 = pneg %p817_p10 }
  0x2a   : > { %p825_p8 = pnand %p824_p4, %p818_p1 }
  0x2c   : > { %828 = shalt.err (!%p825_p8)
}
  0x2d   : > { %s1008_s12 = smov 64   ;;  %s1009_s16 = smov 4  }
  0x2e   : > { %723 = dma.hbm_to_vmem [thread:$0]  (!%p1119_p11), %s1384_s3, 256, %s260_s13, [#allocation6], %s1008_s12, %s1008_s12, %s1009_s16  }
  0x2f   : > { %p42_p1 = scmp.ge.s32.totalorder %s40_s15, 2  ;;  %s49_s19 = sadd.s32 1, %s993_s26 }
  0x30   : > { %p56_p2 = scmp.ne.s32.totalorder %s993_s26, %s989_s25  ;;  %p57_p4 = scmp.eq.s32.totalorder %s1005_s29, 0 }
  0x31   : > { %s1404_s15 = smov (%p42_p1, %s40_s15), 0  ;;  %p1387_p8 = scmp.eq.s32.totalorder %s1089_s30, 1 }
  0x32   : > { %1385 = sst [smem:[#allocation15_spill]] %s1404_s15  ;;  %p1146_p6 = por %p57_p4, %p56_p2 }
  0x33   : > { %p1152_p10 = por %p1387_p8, %p56_p2  ;;  %s44_s14 = ssub.s32 %s1001_s28, %s1404_s15 }
  0x34   : > { %p739_p12 = scmp.lt.s32.totalorder %s1005_s29, 2  ;;  %p47_p11 = scmp.eq.s32.totalorder %s44_s14, 0 }
  0x35   : > { %s276_s13 = sand.u32 1, %s993_s26   ;;  %s674_s12 = sshll.u32 %s1001_s28, 7 }
  0x36   : > { %s673_s22 = sshll.u32 %s276_s13, 3  ;;  %s1167_s18 = scalar_lea.hbm %s1366_s0, %s674_s12 }
  0x37   : > { %s1161_s23 = scalar_select %p47_p11, %s993_s26, %s49_s19  }
  0x38   : > { %s280_s8 = scalar_lea.vmem [#allocation2], %s673_s22  ;;  %p1173_p13 = pnand %p739_p12, %p1146_p6 }
  0x39   : > { %s288_s3 = sshll.u32 %s280_s8, 4  ;;  %s277_s19 = scalar_lea.sflag [#allocation3], %s276_s13  ;;  %s1169_s3 = int_to_ptr.vmem [resolvable:$true] %s288_s3 }
  0x3a   : > { %s829_s15 = scalar_lea.hbm %s1167_s18, 128  ;;  %p831_p3 = pneg %p1173_p13 }
  0x3b   : > { %p830_p0 = scmp.ne.s32.totalorder %s1167_s18, %s829_s15  ;;  %s834_s12 = scalar_lea.hbm %s1366_s0, 256 }
  0x3c   : > { %p835_p9 = scmp.lt.u32.totalorder %s1167_s18, %s1366_s0  ;;  %p836_p1 = scmp.lt.u32.totalorder %s834_s12, %s829_s15 }
  0x3d   : > { %p832_p5 = pnand %p831_p3, %p830_p0  ;;  %p838_p4 = scmp.lt.u32.totalorder %s829_s15, %s1167_s18 }
  0x3e   : > { %p837_p2 = por %p836_p1, %p835_p9 }
  0x3f   : > { %p833_p7 = pneg %p832_p5 }
  0x40   : > { %p839_p6 = por %p838_p4, %p837_p2 }
  0x42   : > { %p840_p8 = pnand %p839_p6, %p833_p7 }
  0x44   : > { %843 = shalt.err (!%p840_p8)
}
  0x45   : > { %s844_s13 = scalar_lea.vmem %s1169_s3, 128  ;;  %s1010_s17 = smov [#allocation2]  }
  0x46   : > { %p845_p12 = scmp.ne.s32.totalorder %s1169_s3, %s844_s13  ;;  %s849_s22 = sshll.u32 %s1010_s17, 4  ;;  %s850_s22 = int_to_ptr.vmem [resolvable:$false] %s849_s22 }
  0x47   : > { %s851_s8 = scalar_lea.vmem %s850_s22, 256  ;;  %p852_p5 = scmp.lt.s32.totalorder %s1169_s3, %s850_s22 }
  0x48   : > { %p847_p11 = pnand %p845_p12, %p831_p3  ;;  %p853_p9 = scmp.lt.s32.totalorder %s851_s8, %s844_s13 }
  0x4a   : > { %p848_p0 = pneg %p847_p11  ;;  %p854_p1 = por %p853_p9, %p852_p5 }
  0x4c   : > { %p855_p2 = pnand %p854_p1, %p848_p0 }
  0x4e   : > { %858 = shalt.err (!%p855_p2)
}
  0x4f   : > { %727 = dma.hbm_to_vmem [thread:$0]  (!%p1173_p13), %s1167_s18, 128, %s1169_s3, %s277_s19  }
  0x50   : > { %p1390_p7 = scmp.ne.s32.totalorder %s1382_s11, 0 }
  0x51   : > { %s1205_s15 = sand.u32 (!%p1390_p7), 1, %s989_s25   ;;  %p1391_p3 = scmp.ne.s32.totalorder (!%p1390_p7), %s1380_s9, 0 }
  0x52   : > { %297 = sbr.rel (%p1390_p7) target bundleno = 777 (0x309), region = 40  ;;  %s676_s12 = sshll.u32 (!%p1390_p7), %s1205_s15, 3 }
  0x53   : > { %s300_s20 = scalar_lea.sflag (!%p1390_p7), [#allocation3], %s1205_s15  ;;  %s303_s16 = scalar_lea.vmem (!%p1390_p7), [#allocation2], %s676_s12 }
  0x59   : > { %968 = dma.done.wait (%p1391_p3), %s300_s20, 128  }
  0x5a   : > { %970 = vsyncadd (%p1391_p3), %s300_s20, 4294967168  ;;  %p1392_p4 = scmp.eq.s32.totalorder %s1089_s30, 0 }
  0x5c   : > { %972 = dma.done.wait (%p1392_p4), [#allocation6], 256   ;;  %p1393_p13 = pmov %p1392_p4 }
  0x5d   : > { %vm352_vm0 = vcmask 261120   ;;  %v349_v0 = vld [vmem:[%s303_s16] sm:$0xff]  ;;  %v797_v7 = vld [vmem:[#allocation5] sm:$0xff]   ;;  %v1011_v8 = vmov 0.0   ;;  %v798_v9 = vld [vmem:[#allocation5 + $0x8] sm:$0xff]   ;;  %vm1012_vm1 = vmmov 0  }
  0x5e   : > { %974 = vsyncadd (%p1393_p13), [#allocation6], 4294967040  ;;  %v353_v1 = vsel %vm352_vm0, %v349_v0, 0.0  ;;  %700 = vmatprep.subr.bf16.mxu0 %v1011_v8  ;;  %704 = vmatprep.mubr.msk.bf16.mxu0 %vm1012_vm1, %v1011_v8  ;;  %v681_v14 = vld [vmem:[%s1367_s1] ss:$0 sm:$0xff]  ;;  %s1227_s14 = sshll.u32 %s1205_s15, 2 }
  0x5f   : > { %354 = vadd.xlane.f32.xlu0 %v353_v1  ;;  %701 = vmatpush3.bf16.msra.mxu0 %v797_v7  ;;  %v682_v16 = vld [vmem:[%s1368_s2] ss:$0 sm:$0xff]  ;;  %s1233_s17 = sshll.u32 %s997_s27, 6  ;;  %s333_s22 = scalar_lea.vmem [#allocation7], %s1227_s14  ;;  %vm449_vm2 = vcmask 257024  }
  0x60   : > { %702 = vmatprep.subr.bf16.mxu0 %v1011_v8  ;;  %v683_v20 = vld [vmem:[%s1370_s4] ss:$0 sm:$0xff]  ;;  %s487_s8 = sshll.u32 %s333_s22, 4  ;;  %s1240_s16 = scalar_lea.hbm %s1371_s5, %s1233_s17  ;;  %s1242_s8 = int_to_ptr.vmem [resolvable:$true] %s487_s8 }
  0x61   : > { %s1013_s27 = smov 96   ;;  %s463_s3 = scalar_lea.sflag [#allocation4], %s1205_s15 }
  0x62   : > { %s859_s9 = scalar_lea.vmem %s1242_s8, 64  ;;  %s1014_s11 = smov [#allocation7]  }
  0x63   : > { %703 = vmatpush3.bf16.msra.mxu0 %v798_v9  ;;  %p860_p6 = scmp.ne.s32.totalorder %s1242_s8, %s859_s9  ;;  %s863_s18 = sshll.u32 %s1014_s11, 4  ;;  %s864_s18 = int_to_ptr.vmem [resolvable:$false] %s863_s18 }
  0x64   : > { %s865_s19 = scalar_lea.vmem %s864_s18, 128  ;;  %p866_p11 = scmp.lt.s32.totalorder %s1242_s8, %s864_s18 }
  0x65   : > { %p861_p8 = pnand %p860_p6, %p1152_p10  ;;  %p867_p0 = scmp.lt.s32.totalorder %s865_s19, %s859_s9 }
  0x67   : > { %p862_p12 = pneg %p861_p8  ;;  %p868_p5 = por %p867_p0, %p866_p11 }
  0x69   : > { %p869_p9 = pnand %p868_p5, %p862_p12 }
  0xec   : > { %v355_v2 = vpop.xlane.xlu0 %354 }
  0xed   : > { %v357_v3 = vmul.f32 0.03125, %v355_v2 }
  0xef   : > { %v358_v4 = vsub.f32 %v349_v0, %v357_v3 }
  0xf1   : > { %v359_v5 = vmul.f32 %v358_v4, %v358_v4 }
  0xf3   : > { %v360_v6 = vsel %vm352_vm0, %v359_v5, 0.0 }
  0xf4   : > { %361 = vadd.xlane.f32.xlu0 %v360_v6 }
 0x181   : > { %v362_v10 = vpop.xlane.xlu0 %361 }
 0x182   : > { %v363_v11 = vmul.f32 0.03125, %v362_v10 }
 0x184   : > { %v364_v12 = vadd.f32 1e-05, %v363_v11 }
 0x186   : > { %799 = vrsqrt.f32 %v364_v12 }
 0x190   : > { %v800_v13 = vpop.eup %799 }
 0x191   : > { %v366_v15 = vmul.f32 %v800_v13, %v358_v4 }
 0x193   : > { %v373_v17 = vmul.f32 %v681_v14, %v366_v15 }
 0x195   : > { %v380_v18 = vadd.f32 %v682_v16, %v373_v17 }
 0x197   : > { %v381_v19 = vpack.c.bf16 %v380_v18, %v380_v18 }
 0x199   : > { %705 = vmatmul.mubr.msk.bf16.vlgmr.msra.gmra.mrb[0].mxu0 %vm352_vm0, %v381_v19 }
 0x26c   : > { %v442_v21 = vpop.f32.mrb[0].mxu0 }
 0x26d   : > { %v443_v22 = vadd.f32 %v683_v20, %v442_v21  ;;  %v706_v23 = vpop.f32.mrb[1].mxu0 }
 0x26e   : > { %v445_v24 = vpop.f32.mrb[2].mxu0 }
 0x26f   : > { %v448_v25 = vpack.c.bf16 %v443_v22, %v443_v22  ;;  %v707_v26 = vpop.f32.mrb[3].mxu0 }
 0x271   : > { %454 = vrot.lane.b32.xlu1 %v448_v25, %s1013_s27  ;;  %450 = vst.msk [vmem:[%s333_s22] sm:$0xf] %vm449_vm2, %v448_v25 }
 0x272   : > { %872 = shalt.err (!%p869_p9)
}
 0x273   : > { %s873_s15 = scalar_lea.hbm %s1240_s16, 64  ;;  %s877_s12 = scalar_lea.hbm %s1371_s5, 128 }
 0x274   : > { %p874_p1 = scmp.ne.s32.totalorder %s1240_s16, %s873_s15  ;;  %p878_p3 = scmp.lt.u32.totalorder %s1240_s16, %s1371_s5 }
 0x275   : > { %p879_p4 = scmp.lt.u32.totalorder %s877_s12, %s873_s15  ;;  %p881_p6 = scmp.lt.u32.totalorder %s873_s15, %s1240_s16 }
 0x276   : > { %p875_p2 = pnand %p874_p1, %p1152_p10 }
 0x277   : > { %p880_p13 = por %p879_p4, %p878_p3 }
 0x278   : > { %p876_p7 = pneg %p875_p2 }
 0x279   : > { %p882_p8 = por %p881_p6, %p880_p13 }
 0x27b   : > { %p883_p12 = pnand %p882_p8, %p876_p7 }
 0x27d   : > { %886 = shalt.err (!%p883_p12)
}
 0x27e   : > { %714 = dma.vmem_to_hbm [thread:$0]  (%p1152_p10), %s1242_s8, 64, %s1240_s16, %s463_s3  }
 0x27f   : > { %s1015_s9 = smov 64   ;;  %s467_s11 = sand.u32 1, %s1089_s30  }
 0x280   : > { %458 = vrot.lane.b32.xlu1 %v448_v25, %s1015_s9  ;;  %s340_s18 = scalar_lea.vmem [#allocation8], %s1227_s14  ;;  %s1273_s22 = scalar_lea.hbm %s1372_s6, %s1233_s17 }
 0x281   : > { %s501_s19 = sshll.u32 %s340_s18, 4  ;;  %s347_s12 = scalar_lea.vmem [#allocation10], %s1227_s14  ;;  %s1275_s19 = int_to_ptr.vmem [resolvable:$true] %s501_s19 }
 0x282   : > { %s1280_s20 = sshll.u32 %s347_s12, 4  ;;  %s1283_s30 = scalar_lea.sflag [#allocation9], %s467_s11  ;;  %s1314_s20 = int_to_ptr.vmem [resolvable:$true] %s1280_s20 }
 0x283   : > { %s887_s8 = scalar_lea.vmem %s1275_s19, 64  ;;  %s1016_s16 = smov [#allocation8]  }
 0x284   : > { %p888_p11 = scmp.ne.s32.totalorder %s1275_s19, %s887_s8  ;;  %s891_s3 = sshll.u32 %s1016_s16, 4  ;;  %s892_s3 = int_to_ptr.vmem [resolvable:$false] %s891_s3 }
 0x285   : > { %s893_s27 = scalar_lea.vmem %s892_s3, 128  ;;  %p894_p9 = scmp.lt.s32.totalorder %s1275_s19, %s892_s3 }
 0x286   : > { %p889_p0 = pnand %p888_p11, %p1152_p10  ;;  %p895_p1 = scmp.lt.s32.totalorder %s893_s27, %s887_s8 }
 0x288   : > { %p890_p5 = pneg %p889_p0  ;;  %p896_p2 = por %p895_p1, %p894_p9 }
 0x28a   : > { %p897_p7 = pnand %p896_p2, %p890_p5 }
 0x2e3   : > { %v455_v27 = vpop.permute.xlu1 %454 }
 0x2e4   : > { %457 = vst.msk [vmem:[%s340_s18] sm:$0xf] %vm449_vm2, %v455_v27 }
 0x2e5   : > { %900 = shalt.err (!%p897_p7)
}
 0x2e6   : > { %s901_s9 = scalar_lea.hbm %s1273_s22, 64  ;;  %s905_s15 = scalar_lea.hbm %s1372_s6, 128 }
 0x2e7   : > { %p902_p3 = scmp.ne.s32.totalorder %s1273_s22, %s901_s9  ;;  %p906_p6 = scmp.lt.u32.totalorder %s1273_s22, %s1372_s6 }
 0x2e8   : > { %p907_p8 = scmp.lt.u32.totalorder %s905_s15, %s901_s9  ;;  %p909_p11 = scmp.lt.u32.totalorder %s901_s9, %s1273_s22 }
 0x2e9   : > { %p903_p4 = pnand %p902_p3, %p1152_p10 }
 0x2ea   : > { %p908_p12 = por %p907_p8, %p906_p6 }
 0x2eb   : > { %p904_p13 = pneg %p903_p4 }
 0x2ec   : > { %p910_p0 = por %p909_p11, %p908_p12 }
 0x2ee   : > { %p911_p5 = pnand %p910_p0, %p904_p13 }
 0x2f0   : > { %914 = shalt.err (!%p911_p5)
}
 0x2f1   : > { %715 = dma.vmem_to_hbm [thread:$0]  (%p1152_p10), %s1275_s19, 64, %s1273_s22, %s1283_s30  }
 0x2f2   : > { %s1311_s27 = scalar_lea.hbm %s1373_s7, %s1233_s17  ;;  %v459_v28 = vpop.permute.xlu1 %458  ;;  %s915_s9 = scalar_lea.vmem %s1314_s20, 64 }
 0x2f3   : > { %461 = vst.msk [vmem:[%s347_s12] sm:$0xf] %vm449_vm2, %v459_v28  ;;  %p916_p9 = scmp.ne.s32.totalorder %s1314_s20, %s915_s9  ;;  %s1017_s19 = smov [#allocation10]  }
 0x2f4   : > { %s919_s22 = sshll.u32 %s1017_s19, 4  ;;  %s920_s22 = int_to_ptr.vmem [resolvable:$false] %s919_s22 }
 0x2f5   : > { %p917_p1 = pnand %p916_p9, %p1152_p10  ;;  %s921_s11 = scalar_lea.vmem %s920_s22, 128 }
 0x2f6   : > { %p922_p7 = scmp.lt.s32.totalorder %s1314_s20, %s920_s22  ;;  %p923_p3 = scmp.lt.s32.totalorder %s921_s11, %s915_s9 }
 0x2f7   : > { %p918_p2 = pneg %p917_p1 }
 0x2f8   : > { %p924_p4 = por %p923_p3, %p922_p7 }
 0x2fa   : > { %p925_p13 = pnand %p924_p4, %p918_p2 }
 0x2fc   : > { %928 = shalt.err (!%p925_p13)
}
 0x2fd   : > { %s929_s14 = scalar_lea.hbm %s1311_s27, 64  ;;  %s933_s18 = scalar_lea.hbm %s1373_s7, 128 }
 0x2fe   : > { %p930_p6 = scmp.ne.s32.totalorder %s1311_s27, %s929_s14  ;;  %p934_p11 = scmp.lt.u32.totalorder %s1311_s27, %s1373_s7 }
 0x2ff   : > { %p935_p0 = scmp.lt.u32.totalorder %s933_s18, %s929_s14  ;;  %p937_p9 = scmp.lt.u32.totalorder %s929_s14, %s1311_s27 }
 0x300   : > { %p931_p8 = pnand %p930_p6, %p1152_p10 }
 0x301   : > { %p936_p5 = por %p935_p0, %p934_p11 }
 0x302   : > { %p932_p12 = pneg %p931_p8 }
 0x303   : > { %p938_p1 = por %p937_p9, %p936_p5 }
 0x305   : > { %p939_p2 = pnand %p938_p1, %p932_p12 }
 0x307   : > { %942 = shalt.err (!%p939_p2)
}
 0x308   : > { %716 = dma.vmem_to_hbm [thread:$0]  (%p1152_p10), %s1314_s20, 64, %s1311_s27, %s1283_s30  }
 0x309 PF: > { %s527_s16 = sand.u32 1, %s985_s24   ;;  %p1394_p7 = scmp.ne.s32.totalorder %s1381_s10, 0 }
 0x30a   : > { %p1395_p3 = scmp.ge.s32.totalorder %s1005_s29, 2  ;;  %s528_s8 = scalar_lea.sflag [#allocation4], %s527_s16 }
 0x30c   : > { %p729_p4 = pnand %p1395_p3, %p1394_p7 }
 0x30e   : > { %976 = dma.done.wait (!%p729_p4), %s528_s8, 64  }
 0x30f   : > { %978 = vsyncadd (!%p729_p4), %s528_s8, 4294967232  ;;  %s1396_s3 = sadd.s32 4294967294, %s1005_s29  }
 0x310   : > { %s536_s9 = sand.u32 1, %s1396_s3  }
 0x311   : > { %s537_s19 = scalar_lea.sflag [#allocation9], %s536_s9 }
 0x312   : > { %980 = dma.done.wait (!%p729_p4), %s537_s19, 128  }
 0x313   : > { %982 = vsyncadd (!%p729_p4), %s537_s19, 4294967168  ;;  %s28_s29 = sadd.s32 1, %s1005_s29   ;;  %s1397_s21 = sld [smem:[#allocation15_spill]] }
 0x314   : > { %p25_p10 = scmp.ge.s32.totalorder %s28_s29, 4   ;;  %s1398_s24 = smov %s989_s25 }
 0x315   : > { %s1399_s25 = smov %s993_s26  ;;  %s1400_s26 = smov %s1161_s23 }
 0x316   : > { %s1401_s27 = smov %s1001_s28  ;;  %27 = sbr.rel (!%p25_p10) target bundleno = 11 (0xb), region = 121 }
 0x319   : > { %s1402_s28 = smov %s1397_s21 }
 0x31d   :  { %551 = vsyncpa [#allocation3], 1 }
 0x31e   :  { %553 = vsyncpa [#allocation3 + $0x1], 1 }
 0x31f   :  { %554 = vsyncpa [#allocation6], 1 }
 0x320   :  { %555 = vsyncpa [#allocation4], 1 }
 0x321   :  { %557 = vsyncpa [#allocation4 + $0x1], 1 }
 0x322   :  { %558 = vsyncpa [#allocation9], 1 }
 0x323   :  { %560 = vsyncpa [#allocation9 + $0x1], 1 }

// kernel: tpu_custom_call.1
= control target key start
LH: loop header
LB: loop body
LE: loop exit
PB: predicated region body
PF: predicated region fallthrough
CT: control target
= control target key end

     0   :  { %s1366_s0 = inlined_call_operand.hbm [shape: f32[2,8,32], index: 0, kind: input, shape index: {}]   ;;  %s1367_s1 = inlined_call_operand.vmem [shape: f32[1,32], index: 1, kind: input, shape index: {}]   ;;  %s1368_s2 = inlined_call_operand.vmem [shape: f32[1,32], index: 2, kind: input, shape index: {}]   ;;  %s1369_s3 = inlined_call_operand.hbm [shape: bf16[32,96], index: 3, kind: input, shape index: {}]   ;;  %s1370_s4 = inlined_call_operand.vmem [shape: f32[1,96], index: 4, kind: input, shape index: {}]   ;;  %s1371_s5 = inlined_call_operand.hbm [shape: bf16[2,8,32], index: 5, kind: output, shape index: {0}]   ;;  %s1372_s6 = inlined_call_operand.hbm [shape: bf16[2,8,32], index: 6, kind: output, shape index: {1}]   ;;  %s1373_s7 = inlined_call_operand.hbm [shape: bf16[2,8,32], index: 7, kind: output, shape index: {2}]  }
   0x1   :  { %1379 = sst [smem:[#allocation16_spill]] %s1369_s3 }
   0x2   :  { %13 = vsyncpa [#allocation3], 0 }
   0x3   :  { %15 = vsyncpa [#allocation3 + $0x1], 0 }
   0x4   :  { %16 = vsyncpa [#allocation6], 0 }
   0x5   :  { %17 = vsyncpa [#allocation4], 0 }
   0x6   :  { %19 = vsyncpa [#allocation4 + $0x1], 0 }
   0x7   :  { %20 = vsyncpa [#allocation9], 0 }
   0x8   :  { %22 = vsyncpa [#allocation9 + $0x1], 0  ;;  %s1058_s24 = smov 0   ;;  %s1060_s25 = smov 0  }
   0x9   :  { %s1062_s26 = smov 0   ;;  %s1064_s27 = smov 0  }
   0xa   :  { %s1066_s28 = smov 0   ;;  %s1068_s29 = smov 0  }
   0xb LB: > { %s1089_s30 = sadd.s32 4294967295, %s1005_s29   ;;  %s1377_s8 = sadd.s32 4294967294, %s1005_s29   ;;  %s1005_s29 = sphi %s1068_s29, %s28_s29   ;;  %s1001_s28 = sphi %s1066_s28, %s1402_s28   ;;  %s997_s27 = sphi %s1064_s27, %s1401_s27   ;;  %s993_s26 = sphi %s1062_s26, %s1400_s26   ;;  %s989_s25 = sphi %s1060_s25, %s1399_s25   ;;  %s985_s24 = sphi %s1058_s24, %s1398_s24  }
   0xc   : > { %p62_p0 = scmp.ne.s32.totalorder %s989_s25, %s985_s24  ;;  %p1374_p1 = scmp.eq.s32.totalorder %s1089_s30, 0 }
   0xd   : > { %p178_p3 = scmp.eq.s32.totalorder %s1377_s8, 1  ;;  %p670_p5 = scmp.ge.s32.totalorder %s1005_s29, 1 }
   0xe   : > { %p1100_p4 = por %p1374_p1, %p62_p0  ;;  %p241_p7 = scmp.lt.s32.totalorder %s1005_s29, 3 }
   0xf   : > { %p1105_p6 = por %p178_p3, %p62_p0  ;;  %s1007_s12 = smov [#allocation5]  }
  0x10   : > { %s1380_s9 = scalar_select %p1100_p4, 1, 0 }
  0x11   : > { %s1381_s10 = scalar_select %p1105_p6, 1, 0 }
  0x12   : > { %p1110_p8 = pnand %p670_p5, %p241_p7  ;;  %s259_s13 = sshll.u32 %s1007_s12, 4  ;;  %s260_s13 = int_to_ptr.vmem [resolvable:$true] %s259_s13 }
  0x13   : > { %s40_s15 = sadd.s32 1, %s1001_s28  ;;  %s1384_s3 = sld [smem:[#allocation16_spill]] }
  0x14   : > { %s1382_s11 = scalar_select %p1110_p8, 1, 0 }
  0x15   : > { %p720_p9 = pneg %p1110_p8 }
  0x17   : > { %p1119_p11 = pnand %p720_p9, %p1374_p1 }
  0x19   : > { %s801_s18 = scalar_lea.hbm %s1384_s3, 256  ;;  %p803_p13 = pneg %p1119_p11 }
  0x1a   : > { %p802_p12 = scmp.ne.s32.totalorder %s1384_s3, %s801_s18  ;;  %p808_p5 = scmp.lt.u32.totalorder %s801_s18, %s1384_s3 }
  0x1c   : > { %p804_p0 = pnand %p803_p13, %p802_p12 }
  0x1e   : > { %p805_p3 = pneg %p804_p0 }
  0x20   : > { %p810_p7 = pnand %p808_p5, %p805_p3 }
  0x22   : > { %813 = shalt.err (!%p810_p7)
}
  0x23   : > { %s814_s23 = scalar_lea.vmem %s260_s13, 256  ;;  %p822_p2 = scmp.lt.s32.totalorder %s260_s13, %s260_s13 }
  0x24   : > { %p815_p9 = scmp.ne.s32.totalorder %s260_s13, %s814_s23  ;;  %p823_p6 = scmp.lt.s32.totalorder %s814_s23, %s814_s23 }
  0x26   : > { %p817_p10 = pnand %p815_p9, %p803_p13  ;;  %p824_p4 = por %p823_p6, %p822_p2 }
  0x28   : > { %p818_p1 = pneg %p817_p10 }
  0x2a   : > { %p825_p8 = pnand %p824_p4, %p818_p1 }
  0x2c   : > { %828 = shalt.err (!%p825_p8)
}
  0x2d   : > { %s1008_s12 = smov 64   ;;  %s1009_s16 = smov 4  }
  0x2e   : > { %723 = dma.hbm_to_vmem [thread:$0]  (!%p1119_p11), %s1384_s3, 256, %s260_s13, [#allocation6], %s1008_s12, %s1008_s12, %s1009_s16  }
  0x2f   : > { %p42_p1 = scmp.ge.s32.totalorder %s40_s15, 2  ;;  %s49_s19 = sadd.s32 1, %s993_s26 }
  0x30   : > { %p56_p2 = scmp.ne.s32.totalorder %s993_s26, %s989_s25  ;;  %p57_p4 = scmp.eq.s32.totalorder %s1005_s29, 0 }
  0x31   : > { %s1404_s15 = smov (%p42_p1, %s40_s15), 0  ;;  %p1387_p8 = scmp.eq.s32.totalorder %s1089_s30, 1 }
  0x32   : > { %1385 = sst [smem:[#allocation15_spill]] %s1404_s15  ;;  %p1146_p6 = por %p57_p4, %p56_p2 }
  0x33   : > { %p1152_p10 = por %p1387_p8, %p56_p2  ;;  %s44_s14 = ssub.s32 %s1001_s28, %s1404_s15 }
  0x34   : > { %p739_p12 = scmp.lt.s32.totalorder %s1005_s29, 2  ;;  %p47_p11 = scmp.eq.s32.totalorder %s44_s14, 0 }
  0x35   : > { %s276_s13 = sand.u32 1, %s993_s26   ;;  %s674_s12 = sshll.u32 %s1001_s28, 7 }
  0x36   : > { %s673_s22 = sshll.u32 %s276_s13, 3  ;;  %s1167_s18 = scalar_lea.hbm %s1366_s0, %s674_s12 }
  0x37   : > { %s1161_s23 = scalar_select %p47_p11, %s993_s26, %s49_s19  }
  0x38   : > { %s280_s8 = scalar_lea.vmem [#allocation2], %s673_s22  ;;  %p1173_p13 = pnand %p739_p12, %p1146_p6 }
  0x39   : > { %s288_s3 = sshll.u32 %s280_s8, 4  ;;  %s277_s19 = scalar_lea.sflag [#allocation3], %s276_s13  ;;  %s1169_s3 = int_to_ptr.vmem [resolvable:$true] %s288_s3 }
  0x3a   : > { %s829_s15 = scalar_lea.hbm %s1167_s18, 128  ;;  %p831_p3 = pneg %p1173_p13 }
  0x3b   : > { %p830_p0 = scmp.ne.s32.totalorder %s1167_s18, %s829_s15  ;;  %s834_s12 = scalar_lea.hbm %s1366_s0, 256 }
  0x3c   : > { %p835_p9 = scmp.lt.u32.totalorder %s1167_s18, %s1366_s0  ;;  %p836_p1 = scmp.lt.u32.totalorder %s834_s12, %s829_s15 }
  0x3d   : > { %p832_p5 = pnand %p831_p3, %p830_p0  ;;  %p838_p4 = scmp.lt.u32.totalorder %s829_s15, %s1167_s18 }
  0x3e   : > { %p837_p2 = por %p836_p1, %p835_p9 }
  0x3f   : > { %p833_p7 = pneg %p832_p5 }
  0x40   : > { %p839_p6 = por %p838_p4, %p837_p2 }
  0x42   : > { %p840_p8 = pnand %p839_p6, %p833_p7 }
  0x44   : > { %843 = shalt.err (!%p840_p8)
}
  0x45   : > { %s844_s13 = scalar_lea.vmem %s1169_s3, 128  ;;  %s1010_s17 = smov [#allocation2]  }
  0x46   : > { %p845_p12 = scmp.ne.s32.totalorder %s1169_s3, %s844_s13  ;;  %s849_s22 = sshll.u32 %s1010_s17, 4  ;;  %s850_s22 = int_to_ptr.vmem [resolvable:$false] %s849_s22 }
  0x47   : > { %s851_s8 = scalar_lea.vmem %s850_s22, 256  ;;  %p852_p5 = scmp.lt.s32.totalorder %s1169_s3, %s850_s22 }
  0x48   : > { %p847_p11 = pnand %p845_p12, %p831_p3  ;;  %p853_p9 = scmp.lt.s32.totalorder %s851_s8, %s844_s13 }
  0x4a   : > { %p848_p0 = pneg %p847_p11  ;;  %p854_p1 = por %p853_p9, %p852_p5 }
  0x4c   : > { %p855_p2 = pnand %p854_p1, %p848_p0 }
  0x4e   : > { %858 = shalt.err (!%p855_p2)
}
  0x4f   : > { %727 = dma.hbm_to_vmem [thread:$0]  (!%p1173_p13), %s1167_s18, 128, %s1169_s3, %s277_s19  }
  0x50   : > { %p1390_p7 = scmp.ne.s32.totalorder %s1382_s11, 0 }
  0x51   : > { %s1205_s15 = sand.u32 (!%p1390_p7), 1, %s989_s25   ;;  %p1391_p3 = scmp.ne.s32.totalorder (!%p1390_p7), %s1380_s9, 0 }
  0x52   : > { %297 = sbr.rel (%p1390_p7) target bundleno = 777 (0x309), region = 40  ;;  %s676_s12 = sshll.u32 (!%p1390_p7), %s1205_s15, 3 }
  0x53   : > { %s300_s20 = scalar_lea.sflag (!%p1390_p7), [#allocation3], %s1205_s15  ;;  %s303_s16 = scalar_lea.vmem (!%p1390_p7), [#allocation2], %s676_s12 }
  0x59   : > { %968 = dma.done.wait (%p1391_p3), %s300_s20, 128  }
  0x5a   : > { %970 = vsyncadd (%p1391_p3), %s300_s20, 4294967168  ;;  %p1392_p4 = scmp.eq.s32.totalorder %s1089_s30, 0 }
  0x5c   : > { %972 = dma.done.wait (%p1392_p4), [#allocation6], 256   ;;  %p1393_p13 = pmov %p1392_p4 }
  0x5d   : > { %vm352_vm0 = vcmask 261120   ;;  %v349_v0 = vld [vmem:[%s303_s16] sm:$0xff]  ;;  %v797_v7 = vld [vmem:[#allocation5] sm:$0xff]   ;;  %v1011_v8 = vmov 0.0   ;;  %v798_v9 = vld [vmem:[#allocation5 + $0x8] sm:$0xff]   ;;  %vm1012_vm1 = vmmov 0  }
  0x5e   : > { %974 = vsyncadd (%p1393_p13), [#allocation6], 4294967040  ;;  %v353_v1 = vsel %vm352_vm0, %v349_v0, 0.0  ;;  %700 = vmatprep.subr.bf16.mxu0 %v1011_v8  ;;  %704 = vmatprep.mubr.msk.bf16.mxu0 %vm1012_vm1, %v1011_v8  ;;  %v681_v14 = vld [vmem:[%s1367_s1] ss:$0 sm:$0xff]  ;;  %s1227_s14 = sshll.u32 %s1205_s15, 2 }
  0x5f   : > { %354 = vadd.xlane.f32.xlu0 %v353_v1  ;;  %701 = vmatpush3.bf16.msra.mxu0 %v797_v7  ;;  %v682_v16 = vld [vmem:[%s1368_s2] ss:$0 sm:$0xff]  ;;  %s1233_s17 = sshll.u32 %s997_s27, 6  ;;  %s333_s22 = scalar_lea.vmem [#allocation7], %s1227_s14  ;;  %vm449_vm2 = vcmask 257024  }
  0x60   : > { %702 = vmatprep.subr.bf16.mxu0 %v1011_v8  ;;  %v683_v20 = vld [vmem:[%s1370_s4] ss:$0 sm:$0xff]  ;;  %s487_s8 = sshll.u32 %s333_s22, 4  ;;  %s1240_s16 = scalar_lea.hbm %s1371_s5, %s1233_s17  ;;  %s1242_s8 = int_to_ptr.vmem [resolvable:$true] %s487_s8 }
  0x61   : > { %s1013_s27 = smov 96   ;;  %s463_s3 = scalar_lea.sflag [#allocation4], %s1205_s15 }
  0x62   : > { %s859_s9 = scalar_lea.vmem %s1242_s8, 64  ;;  %s1014_s11 = smov [#allocation7]  }
  0x63   : > { %703 = vmatpush3.bf16.msra.mxu0 %v798_v9  ;;  %p860_p6 = scmp.ne.s32.totalorder %s1242_s8, %s859_s9  ;;  %s863_s18 = sshll.u32 %s1014_s11, 4  ;;  %s864_s18 = int_to_ptr.vmem [resolvable:$false] %s863_s18 }
  0x64   : > { %s865_s19 = scalar_lea.vmem %s864_s18, 128  ;;  %p866_p11 = scmp.lt.s32.totalorder %s1242_s8, %s864_s18 }
  0x65   : > { %p861_p8 = pnand %p860_p6, %p1152_p10  ;;  %p867_p0 = scmp.lt.s32.totalorder %s865_s19, %s859_s9 }
  0x67   : > { %p862_p12 = pneg %p861_p8  ;;  %p868_p5 = por %p867_p0, %p866_p11 }
  0x69   : > { %p869_p9 = pnand %p868_p5, %p862_p12 }
  0xec   : > { %v355_v2 = vpop.xlane.xlu0 %354 }
  0xed   : > { %v357_v3 = vmul.f32 0.03125, %v355_v2 }
  0xef   : > { %v358_v4 = vsub.f32 %v349_v0, %v357_v3 }
  0xf1   : > { %v359_v5 = vmul.f32 %v358_v4, %v358_v4 }
  0xf3   : > { %v360_v6 = vsel %vm352_vm0, %v359_v5, 0.0 }
  0xf4   : > { %361 = vadd.xlane.f32.xlu0 %v360_v6 }
 0x181   : > { %v362_v10 = vpop.xlane.xlu0 %361 }
 0x182   : > { %v363_v11 = vmul.f32 0.03125, %v362_v10 }
 0x184   : > { %v364_v12 = vadd.f32 1e-05, %v363_v11 }
 0x186   : > { %799 = vrsqrt.f32 %v364_v12 }
 0x190   : > { %v800_v13 = vpop.eup %799 }
 0x191   : > { %v366_v15 = vmul.f32 %v800_v13, %v358_v4 }
 0x193   : > { %v373_v17 = vmul.f32 %v681_v14, %v366_v15 }
 0x195   : > { %v380_v18 = vadd.f32 %v682_v16, %v373_v17 }
 0x197   : > { %v381_v19 = vpack.c.bf16 %v380_v18, %v380_v18 }
 0x199   : > { %705 = vmatmul.mubr.msk.bf16.vlgmr.msra.gmra.mrb[0].mxu0 %vm352_vm0, %v381_v19 }
 0x26c   : > { %v442_v21 = vpop.f32.mrb[0].mxu0 }
 0x26d   : > { %v443_v22 = vadd.f32 %v683_v20, %v442_v21  ;;  %v706_v23 = vpop.f32.mrb[1].mxu0 }
 0x26e   : > { %v445_v24 = vpop.f32.mrb[2].mxu0 }
 0x26f   : > { %v448_v25 = vpack.c.bf16 %v443_v22, %v443_v22  ;;  %v707_v26 = vpop.f32.mrb[3].mxu0 }
 0x271   : > { %454 = vrot.lane.b32.xlu1 %v448_v25, %s1013_s27  ;;  %450 = vst.msk [vmem:[%s333_s22] sm:$0xf] %vm449_vm2, %v448_v25 }
 0x272   : > { %872 = shalt.err (!%p869_p9)
}
 0x273   : > { %s873_s15 = scalar_lea.hbm %s1240_s16, 64  ;;  %s877_s12 = scalar_lea.hbm %s1371_s5, 128 }
 0x274   : > { %p874_p1 = scmp.ne.s32.totalorder %s1240_s16, %s873_s15  ;;  %p878_p3 = scmp.lt.u32.totalorder %s1240_s16, %s1371_s5 }
 0x275   : > { %p879_p4 = scmp.lt.u32.totalorder %s877_s12, %s873_s15  ;;  %p881_p6 = scmp.lt.u32.totalorder %s873_s15, %s1240_s16 }
 0x276   : > { %p875_p2 = pnand %p874_p1, %p1152_p10 }
 0x277   : > { %p880_p13 = por %p879_p4, %p878_p3 }
 0x278   : > { %p876_p7 = pneg %p875_p2 }
 0x279   : > { %p882_p8 = por %p881_p6, %p880_p13 }
 0x27b   : > { %p883_p12 = pnand %p882_p8, %p876_p7 }
 0x27d   : > { %886 = shalt.err (!%p883_p12)
}
 0x27e   : > { %714 = dma.vmem_to_hbm [thread:$0]  (%p1152_p10), %s1242_s8, 64, %s1240_s16, %s463_s3  }
 0x27f   : > { %s1015_s9 = smov 64   ;;  %s467_s11 = sand.u32 1, %s1089_s30  }
 0x280   : > { %458 = vrot.lane.b32.xlu1 %v448_v25, %s1015_s9  ;;  %s340_s18 = scalar_lea.vmem [#allocation8], %s1227_s14  ;;  %s1273_s22 = scalar_lea.hbm %s1372_s6, %s1233_s17 }
 0x281   : > { %s501_s19 = sshll.u32 %s340_s18, 4  ;;  %s347_s12 = scalar_lea.vmem [#allocation10], %s1227_s14  ;;  %s1275_s19 = int_to_ptr.vmem [resolvable:$true] %s501_s19 }
 0x282   : > { %s1280_s20 = sshll.u32 %s347_s12, 4  ;;  %s1283_s30 = scalar_lea.sflag [#allocation9], %s467_s11  ;;  %s1314_s20 = int_to_ptr.vmem [resolvable:$true] %s1280_s20 }
 0x283   : > { %s887_s8 = scalar_lea.vmem %s1275_s19, 64  ;;  %s1016_s16 = smov [#allocation8]  }
 0x284   : > { %p888_p11 = scmp.ne.s32.totalorder %s1275_s19, %s887_s8  ;;  %s891_s3 = sshll.u32 %s1016_s16, 4  ;;  %s892_s3 = int_to_ptr.vmem [resolvable:$false] %s891_s3 }
 0x285   : > { %s893_s27 = scalar_lea.vmem %s892_s3, 128  ;;  %p894_p9 = scmp.lt.s32.totalorder %s1275_s19, %s892_s3 }
 0x286   : > { %p889_p0 = pnand %p888_p11, %p1152_p10  ;;  %p895_p1 = scmp.lt.s32.totalorder %s893_s27, %s887_s8 }
 0x288   : > { %p890_p5 = pneg %p889_p0  ;;  %p896_p2 = por %p895_p1, %p894_p9 }
 0x28a   : > { %p897_p7 = pnand %p896_p2, %p890_p5 }
 0x2e3   : > { %v455_v27 = vpop.permute.xlu1 %454 }
 0x2e4   : > { %457 = vst.msk [vmem:[%s340_s18] sm:$0xf] %vm449_vm2, %v455_v27 }
 0x2e5   : > { %900 = shalt.err (!%p897_p7)
}
 0x2e6   : > { %s901_s9 = scalar_lea.hbm %s1273_s22, 64  ;;  %s905_s15 = scalar_lea.hbm %s1372_s6, 128 }
 0x2e7   : > { %p902_p3 = scmp.ne.s32.totalorder %s1273_s22, %s901_s9  ;;  %p906_p6 = scmp.lt.u32.totalorder %s1273_s22, %s1372_s6 }
 0x2e8   : > { %p907_p8 = scmp.lt.u32.totalorder %s905_s15, %s901_s9  ;;  %p909_p11 = scmp.lt.u32.totalorder %s901_s9, %s1273_s22 }
 0x2e9   : > { %p903_p4 = pnand %p902_p3, %p1152_p10 }
 0x2ea   : > { %p908_p12 = por %p907_p8, %p906_p6 }
 0x2eb   : > { %p904_p13 = pneg %p903_p4 }
 0x2ec   : > { %p910_p0 = por %p909_p11, %p908_p12 }
 0x2ee   : > { %p911_p5 = pnand %p910_p0, %p904_p13 }
 0x2f0   : > { %914 = shalt.err (!%p911_p5)
}
 0x2f1   : > { %715 = dma.vmem_to_hbm [thread:$0]  (%p1152_p10), %s1275_s19, 64, %s1273_s22, %s1283_s30  }
 0x2f2   : > { %s1311_s27 = scalar_lea.hbm %s1373_s7, %s1233_s17  ;;  %v459_v28 = vpop.permute.xlu1 %458  ;;  %s915_s9 = scalar_lea.vmem %s1314_s20, 64 }
 0x2f3   : > { %461 = vst.msk [vmem:[%s347_s12] sm:$0xf] %vm449_vm2, %v459_v28  ;;  %p916_p9 = scmp.ne.s32.totalorder %s1314_s20, %s915_s9  ;;  %s1017_s19 = smov [#allocation10]  }
 0x2f4   : > { %s919_s22 = sshll.u32 %s1017_s19, 4  ;;  %s920_s22 = int_to_ptr.vmem [resolvable:$false] %s919_s22 }
 0x2f5   : > { %p917_p1 = pnand %p916_p9, %p1152_p10  ;;  %s921_s11 = scalar_lea.vmem %s920_s22, 128 }
 0x2f6   : > { %p922_p7 = scmp.lt.s32.totalorder %s1314_s20, %s920_s22  ;;  %p923_p3 = scmp.lt.s32.totalorder %s921_s11, %s915_s9 }
 0x2f7   : > { %p918_p2 = pneg %p917_p1 }
 0x2f8   : > { %p924_p4 = por %p923_p3, %p922_p7 }
 0x2fa   : > { %p925_p13 = pnand %p924_p4, %p918_p2 }
 0x2fc   : > { %928 = shalt.err (!%p925_p13)
}
 0x2fd   : > { %s929_s14 = scalar_lea.hbm %s1311_s27, 64  ;;  %s933_s18 = scalar_lea.hbm %s1373_s7, 128 }
 0x2fe   : > { %p930_p6 = scmp.ne.s32.totalorder %s1311_s27, %s929_s14  ;;  %p934_p11 = scmp.lt.u32.totalorder %s1311_s27, %s1373_s7 }
 0x2ff   : > { %p935_p0 = scmp.lt.u32.totalorder %s933_s18, %s929_s14  ;;  %p937_p9 = scmp.lt.u32.totalorder %s929_s14, %s1311_s27 }
 0x300   : > { %p931_p8 = pnand %p930_p6, %p1152_p10 }
 0x301   : > { %p936_p5 = por %p935_p0, %p934_p11 }
 0x302   : > { %p932_p12 = pneg %p931_p8 }
 0x303   : > { %p938_p1 = por %p937_p9, %p936_p5 }
 0x305   : > { %p939_p2 = pnand %p938_p1, %p932_p12 }
 0x307   : > { %942 = shalt.err (!%p939_p2)
}
 0x308   : > { %716 = dma.vmem_to_hbm [thread:$0]  (%p1152_p10), %s1314_s20, 64, %s1311_s27, %s1283_s30  }
 0x309 PF: > { %s527_s16 = sand.u32 1, %s985_s24   ;;  %p1394_p7 = scmp.ne.s32.totalorder %s1381_s10, 0 }
 0x30a   : > { %p1395_p3 = scmp.ge.s32.totalorder %s1005_s29, 2  ;;  %s528_s8 = scalar_lea.sflag [#allocation4], %s527_s16 }
 0x30c   : > { %p729_p4 = pnand %p1395_p3, %p1394_p7 }
 0x30e   : > { %976 = dma.done.wait (!%p729_p4), %s528_s8, 64  }
 0x30f   : > { %978 = vsyncadd (!%p729_p4), %s528_s8, 4294967232  ;;  %s1396_s3 = sadd.s32 4294967294, %s1005_s29  }
 0x310   : > { %s536_s9 = sand.u32 1, %s1396_s3  }
 0x311   : > { %s537_s19 = scalar_lea.sflag [#allocation9], %s536_s9 }
 0x312   : > { %980 = dma.done.wait (!%p729_p4), %s537_s19, 128  }
 0x313   : > { %982 = vsyncadd (!%p729_p4), %s537_s19, 4294967168  ;;  %s28_s29 = sadd.s32 1, %s1005_s29   ;;  %s1397_s21 = sld [smem:[#allocation15_spill]] }
 0x314   : > { %p25_p10 = scmp.ge.s32.totalorder %s28_s29, 4   ;;  %s1398_s24 = smov %s989_s25 }
 0x315   : > { %s1399_s25 = smov %s993_s26  ;;  %s1400_s26 = smov %s1161_s23 }
 0x316   : > { %s1401_s27 = smov %s1001_s28  ;;  %27 = sbr.rel (!%p25_p10) target bundleno = 11 (0xb), region = 121 }
 0x319   : > { %s1402_s28 = smov %s1397_s21 }
 0x31d   :  { %551 = vsyncpa [#allocation3], 1 }
 0x31e   :  { %553 = vsyncpa [#allocation3 + $0x1], 1 }
 0x31f   :  { %554 = vsyncpa [#allocation6], 1 }
 0x320   :  { %555 = vsyncpa [#allocation4], 1 }
 0x321   :  { %557 = vsyncpa [#allocation4 + $0x1], 1 }
 0x322   :  { %558 = vsyncpa [#allocation9], 1 }
 0x323   :  { %560 = vsyncpa [#allocation9 + $0x1], 1 }

</bundles_post_ra>
